<compile_context>
chip_gen: v7x
topology: tpu7x:2x2x1
jax: 0.10.0
libtpu: 0.0.40
codegen_flags: <defaults>
</compile_context>

<pallas_src>
import functools

import jax
import jax.numpy as jnp
from jax.experimental import pallas as pl
from jax.experimental.pallas import tpu as pltpu


def _round_up(x: int, m: int) -> int:
    return ((x + m - 1) // m) * m


def _lag_head_kernel(x_ref, w_ref, o_ref):
    # x_ref: (TM, K)   w_ref: (K, O)  (resident)   o_ref: (TM, O)
    o_ref[...] = jnp.dot(
        x_ref[...],
        w_ref[...],
        preferred_element_type=jnp.float32,
        precision=jax.lax.Precision.HIGHEST,
    ).astype(o_ref.dtype)


@functools.partial(jax.jit, static_argnames=("target_tile_bytes", "max_tm"))
def lag_head(x, coeff, *, target_tile_bytes: int = 2 << 20, max_tm: int = 2048):
    """x: (B, n_components, dof); coeff: (n_components, dof, out_channels)."""
    B = x.shape[0]
    I, D, O = coeff.shape
    assert x.shape[1:] == (I, D), (x.shape, coeff.shape)
    K = I * D

    out_dtype = jnp.result_type(x.dtype, coeff.dtype)

    # Row-major reshapes are layout-preserving: no HBM transpose / copy pass.
    x2d = x.reshape(B, K)
    w2d = coeff.reshape(K, O)

    itemsize = x2d.dtype.itemsize
    out_itemsize = jnp.dtype(out_dtype).itemsize

    # Batch tile: target ~target_tile_bytes of x per grid step, multiple of 8 rows.
    tm = max(8, (target_tile_bytes // max(1, K * itemsize)) // 8 * 8)
    tm = min(tm, max_tm)
    # Keep at least 2 batch tiles when B allows it (v7x has 2 TensorCores).
    if B >= 16:
        tm = min(tm, _round_up(pl.cdiv(B, 2), 8))
    if tm >= B:
        tm = B  # single full-extent block (block dim == array dim is always legal)
    grid_m = pl.cdiv(B, tm)

    # VMEM budget from the real footprint: double-buffered x/out streams + the
    # (2-buffered) resident weight, plus slack for compiler-internal scratch.
    x_tile_bytes = tm * K * itemsize
    o_tile_bytes = tm * O * out_itemsize
    w_bytes = K * O * w2d.dtype.itemsize
    vmem_need = 2 * (x_tile_bytes + o_tile_bytes) + 2 * w_bytes
    vmem_limit = int(min(max(2 * vmem_need + (4 << 20), 8 << 20), 64 << 20))
    # TODO(synk): add an out_channels grid axis (tile O) if K*O ever outgrows VMEM
    # (only relevant for out_channels in the many-thousands on v7x's 64 MiB).

    out = pl.pallas_call(
        _lag_head_kernel,
        out_shape=jax.ShapeDtypeStruct((B, O), out_dtype),
        grid_spec=pltpu.PrefetchScalarGridSpec(
            num_scalar_prefetch=0,
            grid=(grid_m,),
            in_specs=[
                # x streams over the batch axis; full K as the last dim (no K pad).
                pl.BlockSpec((tm, K), lambda i: (i, 0)),
                # Weight block index is constant -> DMA'd once, VMEM-resident.
                pl.BlockSpec((K, O), lambda i: (0, 0)),
            ],
            out_specs=pl.BlockSpec((tm, O), lambda i: (i, 0)),
        ),
        compiler_params=pltpu.CompilerParams(
            # Independent batch tiles -> parallel (sharded across v7x's 2 TCs).
            dimension_semantics=("parallel",),
            vmem_limit_bytes=vmem_limit,
        ),
    )(x2d, w2d)

    return out


if __name__ == "__main__":
    # Shapes consistent with the module: x is (B, n_components, dof),
    # coeff is (n_components, dof, out_channels).
    B, n_components, dof, out_channels = 2, 4, 8, 16

    key = jax.random.PRNGKey(0)
    kx, kc = jax.random.split(key, 2)

    x = jax.random.normal(kx, (B, n_components, dof), dtype=jnp.float32)
    # The module initializes coeff to zeros; use random values so the check is
    # non-trivial (forward semantics are identical).
    coeff = (
        jax.random.normal(kc, (n_components, dof, out_channels), dtype=jnp.float32)
        * 0.1
    )

    out = jax.block_until_ready(lag_head(x, coeff))

    # Pure-JAX reference: torch.einsum('bid,ido->bo', x, coeff).
    ref = jnp.einsum("bid,ido->bo", x, coeff)
    assert out.shape == (B, out_channels), out.shape
    assert jnp.allclose(out, ref, atol=1e-4, rtol=1e-4)

    # Zero-initialized parameter case (module's default init).
    out0 = jax.block_until_ready(lag_head(x, jnp.zeros_like(coeff)))
    assert jnp.allclose(out0, jnp.zeros((B, out_channels), jnp.float32))

    print("KERNEL_OK")
</pallas_src>

<mosaic_0001>
module attributes {stable_mosaic.version = 11 : i64} {
  func.func @_lag_head_kernel(%arg0: i32, %arg1: memref<2x32xf32, #tpu.memory_space<vmem>>, %arg2: memref<32x16xf32, #tpu.memory_space<vmem>>, %arg3: memref<2x16xf32, #tpu.memory_space<vmem>>) attributes {dimension_semantics = [#tpu.dimension_semantics<parallel>], iteration_bounds = array<i64: 1>, scalar_prefetch = 0 : i64, scratch_operands = 0 : i64, tpu.core_type = #tpu.core_type<tc>, window_params = [{transform_indices = @transform_0, window_bounds = array<i64: 2, 32>}, {pipeline_mode = #tpu.pipeline_mode<synchronous>, transform_indices = @transform_1, window_bounds = array<i64: 32, 16>}, {transform_indices = @transform_2, window_bounds = array<i64: 2, 16>}]} {
    %c0 = arith.constant 0 : index
    %c0_0 = arith.constant 0 : index
    %0 = vector.load %arg1[%c0, %c0_0] : memref<2x32xf32, #tpu.memory_space<vmem>>, vector<2x32xf32>
    %c0_1 = arith.constant 0 : index
    %c0_2 = arith.constant 0 : index
    %1 = vector.load %arg2[%c0_1, %c0_2] : memref<32x16xf32, #tpu.memory_space<vmem>>, vector<32x16xf32>
    %cst = arith.constant dense<0.000000e+00> : vector<2x16xf32>
    %2 = tpu.matmul %0, %1, %cst {dimension_numbers = #tpu.dot_dimension_numbers<[1], [0], [0], [1], [0, 0, 1, 1], [], []>, precision = #tpu.contract_precision<fp32>} : vector<2x32xf32>, vector<32x16xf32>, vector<2x16xf32> -> vector<2x16xf32>
    %c0_3 = arith.constant 0 : index
    %c0_4 = arith.constant 0 : index
    %3 = vector.load %arg3[%c0_3, %c0_4] : memref<2x16xf32, #tpu.memory_space<vmem>>, vector<2x16xf32>
    tpu.vector_store %arg3[%c0_3, %c0_4], %2 {strides = array<i32>} : memref<2x16xf32, #tpu.memory_space<vmem>>, vector<2x16xf32>,
    return
  }
  func.func @transform_0(%arg0: i32) -> (i32, i32) {
    %c0_i32 = arith.constant 0 : i32
    %c0_i32_0 = arith.constant 0 : i32
    return %arg0, %c0_i32 : i32, i32
  }
  func.func @transform_1(%arg0: i32) -> (i32, i32) {
    %c0_i32 = arith.constant 0 : i32
    %c0_i32_0 = arith.constant 0 : i32
    %c0_i32_1 = arith.constant 0 : i32
    return %c0_i32, %c0_i32_0 : i32, i32
  }
  func.func @transform_2(%arg0: i32) -> (i32, i32) {
    %c0_i32 = arith.constant 0 : i32
    %c0_i32_0 = arith.constant 0 : i32
    return %arg0, %c0_i32 : i32, i32
  }
}

</mosaic_0001>

<bundles_post_ra>
// kernel: lag_head.1
= control target key start
LH: loop header
LB: loop body
LE: loop exit
PB: predicated region body
PF: predicated region fallthrough
CT: control target
= control target key end

     0   :  { %7 = vsyncpa [#allocation3], 0  ;;  %s806_s0 = inlined_call_operand.vmem [shape: f32[2,32], index: 0, kind: input, shape index: {}]   ;;  %s807_s1 = inlined_call_operand.hbm [shape: f32[32,16], index: 1, kind: input, shape index: {}]   ;;  %s808_s2 = inlined_call_operand.hbm [shape: f32[2,16], index: 2, kind: output, shape index: {}]  }
   0x1   :  { %8 = vsyncpa [#allocation4], 0  ;;  %s733_s9 = smov [#allocation2]   ;;  %s685_s13 = scalar_lea.hbm %s807_s1, 512 }
   0x2   :  { %s16_s10 = sshll.u32 %s733_s9, 4  ;;  %p686_p0 = scmp.ne.s32.totalorder %s807_s1, %s685_s13  ;;  %s17_s10 = int_to_ptr.vmem [resolvable:$true] %s16_s10 }
   0x3   :  { %p689_p1 = scmp.lt.u32.totalorder %s685_s13, %s807_s1 }
   0x5   :  { %p691_p2 = pnand %p689_p1, %p686_p0 }
   0x7   :  { %694 = shalt.err (!%p691_p2)
}
   0x8   :  { %s695_s18 = scalar_lea.vmem %s17_s10, 512  ;;  %p700_p4 = scmp.lt.s32.totalorder %s17_s10, %s17_s10 }
   0x9   :  { %p696_p3 = scmp.ne.s32.totalorder %s17_s10, %s695_s18  ;;  %p701_p5 = scmp.lt.s32.totalorder %s695_s18, %s695_s18 }
   0xb   :  { %p702_p6 = por %p701_p5, %p700_p4 }
   0xd   :  { %p703_p7 = pnand %p702_p6, %p696_p3 }
   0xf   :  { %706 = shalt.err (!%p703_p7)
}
  0x10   :  { %s734_s19 = smov 128   ;;  %s735_s20 = smov 8  }
  0x11   :  { %22 = dma.hbm_to_vmem [thread:$0]  %s807_s1, 512, %s17_s10, [#allocation3], %s734_s19, %s734_s19, %s735_s20  }
  0x12   :  { %729 = dma.done.wait [#allocation3], 512  }
  0x13   :  { %730 = vsyncadd [#allocation3], 4294966784  ;;  %v736_v0 = vmov 0.0|0.0   ;;  %vm737_vm0 = vmmov 0   ;;  %v738_v1 = vmov 0.0   ;;  %vm31_vm1 = vcmask 261120  }
  0x14   :  { %633 = vmatprep.subr.bf16.mxu1 %v736_v0  ;;  %651 = vmatprep.subr.bf16.mxu0 %v736_v0  ;;  %v27_v2 = vld [vmem:[#allocation2] sm:$0xff]  ;;  %v28_v3 = vld [vmem:[#allocation2 + $0x8] sm:$0xff]  ;;  %v29_v4 = vld [vmem:[#allocation2 + $0x10] sm:$0xff]  ;;  %vm520_vm2 = vcmask 123904  }
  0x15   :  { %575 = vmatprep.mubr.msk.f32.mxu1 %vm737_vm0, %v738_v1  ;;  %608 = vmatprep.mubr.msk.f32.mxu0 %vm737_vm0, %v738_v1  ;;  %v36_v5 = vand.u32 4294901760, %v27_v2  ;;  %v39_v6 = vand.u32 4294901760, %v28_v3  ;;  %v30_v7 = vld [vmem:[#allocation2 + $0x18] sm:$0xff]  ;;  %v42_v8 = vand.u32 4294901760, %v29_v4  ;;  %v26_v9 = vld [vmem:[%s806_s0] sm:$0x3] }
  0x16   :  { %v45_v10 = vand.u32 4294901760, %v30_v7  ;;  %v33_v11 = vsel %vm31_vm1, %v26_v9, 0  ;;  %s739_s0 = smov [#allocation5]  }
  0x17   :  { %v634_v12 = vpack.c.bf16 %v39_v6, %v36_v5  ;;  %v116_v13 = vsub.f32 %v27_v2, %v36_v5  ;;  %v123_v14 = vsub.f32 %v28_v3, %v39_v6  ;;  %v130_v15 = vsub.f32 %v29_v4, %v42_v8  ;;  %s528_s24 = sshll.u32 %s739_s0, 4  ;;  %s529_s24 = int_to_ptr.vmem [resolvable:$true] %s528_s24 }
  0x18   :  { %v137_v16 = vsub.f32 %v30_v7, %v45_v10  ;;  %v104_v17 = vand.u32 4294901760, %v33_v11  ;;  %v637_v18 = vpack.c.bf16 %v45_v10, %v42_v8  ;;  %s707_s25 = scalar_lea.vmem %s529_s24, 32  ;;  %p712_p9 = scmp.lt.s32.totalorder %s529_s24, %s529_s24 }
  0x19   :  { %635 = vmatpush3.bf16.msra.mxu1 %v634_v12  ;;  %653 = vmatpush3.bf16.msra.mxu0 %v634_v12  ;;  %v117_v19 = vand.u32 4294901760, %v116_v13  ;;  %v124_v20 = vand.u32 4294901760, %v123_v14  ;;  %v131_v21 = vand.u32 4294901760, %v130_v15  ;;  %v646_v39 = vpack.c.bf16 %v123_v14, %v116_v13  ;;  %p708_p8 = scmp.ne.s32.totalorder %s529_s24, %s707_s25  ;;  %p713_p10 = scmp.lt.s32.totalorder %s707_s25, %s707_s25 }
  0x1a   :  { %636 = vmatprep.subr.bf16.mxu1 %v736_v0  ;;  %654 = vmatprep.subr.bf16.mxu0 %v736_v0  ;;  %v105_v22 = vsub.f32 %v33_v11, %v104_v17  ;;  %v138_v23 = vand.u32 4294901760, %v137_v16  ;;  %v649_v40 = vpack.c.bf16 %v137_v16, %v130_v15 }
  0x1b   :  { %v118_v24 = vsub.f32 %v116_v13, %v117_v19  ;;  %v125_v25 = vsub.f32 %v123_v14, %v124_v20  ;;  %v132_v26 = vsub.f32 %v130_v15, %v131_v21  ;;  %v658_v31 = vpack.c.bf16 %v124_v20, %v117_v19  ;;  %p714_p11 = por %p713_p10, %p712_p9 }
  0x1c   :  { %v106_v27 = vand.u32 4294901760, %v105_v22  ;;  %v139_v28 = vsub.f32 %v137_v16, %v138_v23  ;;  %v661_v37 = vpack.c.bf16 %v138_v23, %v131_v21 }
  0x1d   :  { %638 = vmatpush3.bf16.msra.mxu1 %v637_v18  ;;  %656 = vmatpush3.bf16.msra.mxu0 %v637_v18  ;;  %v119_v29 = vand.u32 4294901760, %v118_v24  ;;  %v126_v30 = vand.u32 4294901760, %v125_v25  ;;  %v133_v34 = vand.u32 4294901760, %v132_v26  ;;  %p715_p12 = pnand %p714_p11, %p708_p8 }
  0x1e   :  { %v107_v32 = vsub.f32 %v105_v22, %v106_v27  ;;  %639 = vmatprep.subr.bf16.mxu1 %v736_v0  ;;  %657 = vmatprep.subr.bf16.mxu0 %v736_v0  ;;  %v140_v35 = vand.u32 4294901760, %v139_v28 }
  0x1f   :  { %v640_v33 = vpack.c.bf16 %v126_v30, %v119_v29 }
  0x20   :  { %v108_v36 = vand.u32 4294901760, %v107_v32  ;;  %609 = vmatmul.mubr.f32.vlgmr.msra.gmra.mrb[0].mxu0 %v106_v27  ;;  %v643_v38 = vpack.c.bf16 %v140_v35, %v133_v34 }
  0x21   :  { %659 = vmatpush3.bf16.msra.mxu0 %v658_v31  ;;  %619 = vmatprep.mubr.msk.f32.mxu0 %vm737_vm0, %v738_v1 }
  0x22   :  { %576 = vmatmul.mubr.f32.vlgmr.msra.gmra.mrb[0].mxu1 %v108_v36  ;;  %660 = vmatprep.subr.bf16.mxu0 %v736_v0 }
  0x23   :  { %641 = vmatpush3.bf16.msra.mxu1 %v640_v33  ;;  %586 = vmatprep.mubr.msk.f32.mxu1 %vm737_vm0, %v738_v1 }
  0x24   :  { %642 = vmatprep.subr.bf16.mxu1 %v736_v0 }
  0x25   :  { %662 = vmatpush3.bf16.msra.mxu0 %v661_v37 }
  0x26   :  { %663 = vmatprep.subr.bf16.mxu0 %v736_v0 }
  0x27   :  { %644 = vmatpush3.bf16.msra.mxu1 %v643_v38 }
  0x28   :  { %645 = vmatprep.subr.bf16.mxu1 %v736_v0  ;;  %620 = vmatmul.mubr.f32.vlgmr.msra.gmra.mrb[0].mxu0 %v104_v17 }
  0x29   :  { %665 = vmatpush3.bf16.msra.mxu0 %v634_v12  ;;  %630 = vmatprep.mubr.msk.f32.mxu0 %vm737_vm0, %v738_v1 }
  0x2a   :  { %587 = vmatmul.mubr.f32.vlgmr.msra.gmra.mrb[0].mxu1 %v104_v17  ;;  %666 = vmatprep.subr.bf16.mxu0 %v736_v0 }
  0x2b   :  { %647 = vmatpush3.bf16.msra.mxu1 %v646_v39  ;;  %597 = vmatprep.mubr.msk.f32.mxu1 %vm737_vm0, %v738_v1 }
  0x2c   :  { %648 = vmatprep.subr.bf16.mxu1 %v736_v0 }
  0x2d   :  { %668 = vmatpush3.bf16.msra.mxu0 %v637_v18 }
  0x2f   :  { %650 = vmatpush3.bf16.msra.mxu1 %v649_v40 }
  0x30   :  { %631 = vmatmul.mubr.f32.vlgmr.msra.gmra.mrb[0].mxu0 %v104_v17 }
  0x32   :  { %598 = vmatmul.mubr.f32.vlgmr.msra.gmra.mrb[0].mxu1 %v105_v22 }
 0x103   :  { %v516_v41 = vpop.f32.mrb[0].mxu0 }
 0x104   :  { %v632_v42 = vpop.f32.mrb[1].mxu0 }
 0x105   :  { %v281_v43 = vpop.f32.mrb[0].mxu1 }
 0x106   :  { %v669_v44 = vadd.f32 %v516_v41, %v281_v43  ;;  %v599_v45 = vpop.f32.mrb[1].mxu1 }
 0x108   :  { %521 = vst.msk [vmem:[#allocation5] sm:$0x3] %vm520_vm2, %v669_v44 }
 0x109   :  { %718 = shalt.err (!%p715_p12)
}
 0x10a   :  { %s719_s28 = scalar_lea.hbm %s808_s2, 32 }
 0x10b   :  { %p720_p13 = scmp.ne.s32.totalorder %s808_s2, %s719_s28  ;;  %p723_p0 = scmp.lt.u32.totalorder %s719_s28, %s808_s2 }
 0x10d   :  { %p725_p1 = pnand %p723_p0, %p720_p13 }
 0x10f   :  { %728 = shalt.err (!%p725_p1)
}
 0x110   :  { %531 = dma.vmem_to_hbm [thread:$0]  %s529_s24, 32, %s808_s2, [#allocation4]  }
 0x111   :  { %731 = dma.done.wait [#allocation4], 32  }
 0x112   :  { %732 = vsyncadd [#allocation4], 4294967264 }
 0x113   :  { %535 = vsyncpa [#allocation3], 1 }
 0x114   :  { %536 = vsyncpa [#allocation4], 1 }

</bundles_post_ra>
